<compile_context>
chip_gen: v7x
topology: tpu7x:2x2x1
jax: 0.10.0
libtpu: 0.0.40
codegen_flags: <defaults>
</compile_context>

<pallas_src>
import functools

import jax
import jax.numpy as jnp
from jax.experimental import pallas as pl
from jax.experimental.pallas import tpu as pltpu


# (in_dim, out_dim, apply_tanh_after) for the 8 Linear layers:
# encoder MLP(256 -> [128, 64, 64] -> 64), decoder MLP(64 -> [64, 64, 128] -> 256)
LAYERS = (
    (256, 128, True),
    (128, 64, True),
    (64, 64, True),
    (64, 64, False),
    (64, 64, True),
    (64, 64, True),
    (64, 128, True),
    (128, 256, False),
)

_MACS_PER_ROW = sum(i * o for i, o, _ in LAYERS)        # 98304 MACs / row
_TANH_PER_ROW = sum(o for _, o, act in LAYERS if act)   # 512 tanh / row


def _default_tanh_bf16():
    # bf16 tanh halves EUP occupancy on v6e/v7x; v5e has no bf16 EUP/VPU path.
    # NOTE: device-kind sniff can be wrong under interpret/AOT — pass
    # tanh_bf16 explicitly in production.
    try:
        kind = jax.devices()[0].device_kind.lower()
        return ("v6" in kind) or ("v7" in kind)
    except Exception:
        return False


_TANH_BF16_DEFAULT = _default_tanh_bf16()


def _round_up(x, m):
    return ((x + m - 1) // m) * m


def _mlp_kernel(x_ref, *refs, tanh_bf16):
    """refs = (w1..w8 [bf16, (in,out)], b1..b8 [f32, (1,out)], out_ref)."""
    n = len(LAYERS)
    w_refs = refs[:n]
    b_refs = refs[n:2 * n]
    out_ref = refs[2 * n]

    h = x_ref[...]
    for (_, _, act), w_ref, b_ref in zip(LAYERS, w_refs, b_refs):
        # bf16 MXU inputs, f32 accumulation.
        acc = jnp.dot(h.astype(jnp.bfloat16), w_ref[...],
                      preferred_element_type=jnp.float32)
        acc = acc + b_ref[...]          # (1, out) bias broadcasts over rows
        if act:
            h = jnp.tanh(acc.astype(jnp.bfloat16)) if tanh_bf16 else jnp.tanh(acc)
        else:
            h = acc
    out_ref[...] = h.astype(out_ref.dtype)


@functools.partial(jax.jit, static_argnames=("block_rows", "tanh_bf16"))
def mlp_module_64_short(desc, weights, biases, *, block_rows=512, tanh_bf16=None):
    """desc: [B, 256] -> [B, 256] (forward of MLP_module_64_short).

    Output dtype matches `desc.dtype`.  Pass bf16 weights (prepare_params) to
    avoid per-call cast ops; f32 weights still work (cast at trace time).
    """
    if tanh_bf16 is None:
        tanh_bf16 = _TANH_BF16_DEFAULT

    B, F = desc.shape
    assert F == LAYERS[0][0]
    out_dim = LAYERS[-1][1]

    # Batch tile: multiple of 8 sublanes.  For B > 8 cap at ceil(B/2) so the
    # grid always has >= 2 steps (both v7x TensorCores busy); tiny batches
    # collapse to a single 8-row tile.
    if B <= 8:
        tb = 8
    else:
        tb = min(block_rows, _round_up(-(-B // 2), 8))
    num_tiles = pl.cdiv(B, tb)   # partial tail block is masked by Pallas

    # Weights are expected pre-cast to bf16 outside jit; this is then a no-op.
    w_bf16 = [w if w.dtype == jnp.bfloat16 else w.astype(jnp.bfloat16)
              for w in weights]
    b_f32 = [b if b.dtype == jnp.float32 else b.astype(jnp.float32)
             for b in biases]

    # Activation tiles walk the batch; parameters use a constant index_map so
    # Pallas fetches them once and keeps them VMEM-resident across the grid.
    const_spec = lambda shape: pl.BlockSpec(shape, lambda i: (0,) * len(shape))
    in_specs = [pl.BlockSpec((tb, F), lambda i: (i, 0))]
    in_specs += [const_spec(tuple(w.shape)) for w in w_bf16]
    in_specs += [const_spec(tuple(b.shape)) for b in b_f32]
    out_specs = pl.BlockSpec((tb, out_dim), lambda i: (i, 0))

    io_item = jnp.dtype(desc.dtype).itemsize
    param_bytes = sum(w.size * 2 for w in w_bf16) + sum(b.size * 4 for b in b_f32)
    cost = pl.CostEstimate(
        flops=2 * _MACS_PER_ROW * B,
        transcendentals=_TANH_PER_ROW * B,
        bytes_accessed=B * (F + out_dim) * io_item + param_bytes,
    )

    return pl.pallas_call(
        functools.partial(_mlp_kernel, tanh_bf16=tanh_bf16),
        out_shape=jax.ShapeDtypeStruct((B, out_dim), desc.dtype),
        grid=(num_tiles,),
        in_specs=in_specs,
        out_specs=out_specs,
        compiler_params=pltpu.CompilerParams(
            dimension_semantics=("parallel",)),
        cost_estimate=cost,
    )(desc, *w_bf16, *b_f32)


def init_params(key):
    """Synthetic f32 params matching the torch module's layer shapes.

    Weights stored as (in, out) so the kernel computes x @ W + b (equivalent
    to torch's x @ W.T + b with torch W of shape (out, in))."""
    weights, biases = [], []
    for in_d, out_d, _ in LAYERS:
        kw, kb, key = jax.random.split(key, 3)
        scale = 1.0 / jnp.sqrt(jnp.float32(in_d))
        weights.append(jax.random.uniform(kw, (in_d, out_d), jnp.float32, -scale, scale))
        biases.append(jax.random.uniform(kb, (1, out_d), jnp.float32, -scale, scale))
    return weights, biases


def prepare_params(weights, biases):
    """One-time (outside jit) bf16 cast of the weights for the kernel."""
    return [jnp.asarray(w, jnp.bfloat16) for w in weights], list(biases)


def reference_forward(desc, weights, biases):
    """Pure-JAX f32 reference."""
    h = desc
    for (_, _, act), w, b in zip(LAYERS, weights, biases):
        h = h @ w + b
        if act:
            h = jnp.tanh(h)
    return h


if __name__ == "__main__":
    key = jax.random.PRNGKey(0)
    kx, kp = jax.random.split(key)

    weights_f32, biases = init_params(kp)
    # Hoisted, one-time bf16 weight cast (outside jit).
    weights_bf16, biases = prepare_params(weights_f32, biases)

    # --- small batch (single 8-row tile) ---
    batch = 8
    desc = jax.random.normal(kx, (batch, 256), jnp.float32)
    out = jax.block_until_ready(mlp_module_64_short(desc, weights_bf16, biases))
    ref = reference_forward(desc, weights_f32, biases)
    assert out.shape == (batch, 256), out.shape
    # bf16 matmul inputs (f32 accumulation) -> relaxed tolerance vs f32 ref.
    assert jnp.allclose(out, ref, atol=5e-2, rtol=5e-2), "mismatch vs reference"

    # --- multi-tile grid with a masked partial tail block (B=20, tb=16) ---
    batch2 = 20
    desc2 = jax.random.normal(kx, (batch2, 256), jnp.float32)
    out2 = jax.block_until_ready(
        mlp_module_64_short(desc2, weights_bf16, biases, block_rows=16))
    ref2 = reference_forward(desc2, weights_f32, biases)
    assert out2.shape == (batch2, 256), out2.shape
    assert jnp.allclose(out2, ref2, atol=5e-2, rtol=5e-2), "mismatch (tiled path)"

    # --- bf16 activation I/O path (input already bf16 upstream) ---
    desc_bf16 = desc.astype(jnp.bfloat16)   # stand-in for an upstream bf16 producer
    out3 = jax.block_until_ready(
        mlp_module_64_short(desc_bf16, weights_bf16, biases))
    assert out3.dtype == jnp.bfloat16, out3.dtype
    assert jnp.allclose(out3.astype(jnp.float32), ref, atol=1e-1, rtol=1e-1), \
        "mismatch (bf16 I/O path)"

    print("KERNEL_OK")
</pallas_src>

<mosaic_0001>
module attributes {stable_mosaic.version = 11 : i64} {
  func.func @_mlp_kernel(%arg0: i32, %arg1: memref<8x256xf32, #tpu.memory_space<vmem>>, %arg2: memref<256x128xbf16, #tpu.memory_space<vmem>>, %arg3: memref<128x64xbf16, #tpu.memory_space<vmem>>, %arg4: memref<64x64xbf16, #tpu.memory_space<vmem>>, %arg5: memref<64x64xbf16, #tpu.memory_space<vmem>>, %arg6: memref<64x64xbf16, #tpu.memory_space<vmem>>, %arg7: memref<64x64xbf16, #tpu.memory_space<vmem>>, %arg8: memref<64x128xbf16, #tpu.memory_space<vmem>>, %arg9: memref<128x256xbf16, #tpu.memory_space<vmem>>, %arg10: memref<1x128xf32, #tpu.memory_space<vmem>>, %arg11: memref<1x64xf32, #tpu.memory_space<vmem>>, %arg12: memref<1x64xf32, #tpu.memory_space<vmem>>, %arg13: memref<1x64xf32, #tpu.memory_space<vmem>>, %arg14: memref<1x64xf32, #tpu.memory_space<vmem>>, %arg15: memref<1x64xf32, #tpu.memory_space<vmem>>, %arg16: memref<1x128xf32, #tpu.memory_space<vmem>>, %arg17: memref<1x256xf32, #tpu.memory_space<vmem>>, %arg18: memref<8x256xf32, #tpu.memory_space<vmem>>) attributes {dimension_semantics = [#tpu.dimension_semantics<parallel>], iteration_bounds = array<i64: 1>, scalar_prefetch = 0 : i64, scratch_operands = 0 : i64, tpu.core_type = #tpu.core_type<tc>, window_params = [{transform_indices = @transform_0, window_bounds = array<i64: 8, 256>}, {pipeline_mode = #tpu.pipeline_mode<synchronous>, transform_indices = @transform_1, window_bounds = array<i64: 256, 128>}, {pipeline_mode = #tpu.pipeline_mode<synchronous>, transform_indices = @transform_2, window_bounds = array<i64: 128, 64>}, {pipeline_mode = #tpu.pipeline_mode<synchronous>, transform_indices = @transform_3, window_bounds = array<i64: 64, 64>}, {pipeline_mode = #tpu.pipeline_mode<synchronous>, transform_indices = @transform_4, window_bounds = array<i64: 64, 64>}, {pipeline_mode = #tpu.pipeline_mode<synchronous>, transform_indices = @transform_5, window_bounds = array<i64: 64, 64>}, {pipeline_mode = #tpu.pipeline_mode<synchronous>, transform_indices = @transform_6, window_bounds = array<i64: 64, 64>}, {pipeline_mode = #tpu.pipeline_mode<synchronous>, transform_indices = @transform_7, window_bounds = array<i64: 64, 128>}, {pipeline_mode = #tpu.pipeline_mode<synchronous>, transform_indices = @transform_8, window_bounds = array<i64: 128, 256>}, {pipeline_mode = #tpu.pipeline_mode<synchronous>, transform_indices = @transform_9, window_bounds = array<i64: 1, 128>}, {pipeline_mode = #tpu.pipeline_mode<synchronous>, transform_indices = @transform_10, window_bounds = array<i64: 1, 64>}, {pipeline_mode = #tpu.pipeline_mode<synchronous>, transform_indices = @transform_11, window_bounds = array<i64: 1, 64>}, {pipeline_mode = #tpu.pipeline_mode<synchronous>, transform_indices = @transform_12, window_bounds = array<i64: 1, 64>}, {pipeline_mode = #tpu.pipeline_mode<synchronous>, transform_indices = @transform_13, window_bounds = array<i64: 1, 64>}, {pipeline_mode = #tpu.pipeline_mode<synchronous>, transform_indices = @transform_14, window_bounds = array<i64: 1, 64>}, {pipeline_mode = #tpu.pipeline_mode<synchronous>, transform_indices = @transform_15, window_bounds = array<i64: 1, 128>}, {pipeline_mode = #tpu.pipeline_mode<synchronous>, transform_indices = @transform_16, window_bounds = array<i64: 1, 256>}, {transform_indices = @transform_17, window_bounds = array<i64: 8, 256>}]} {
    %c0 = arith.constant 0 : index
    %c0_0 = arith.constant 0 : index
    %0 = vector.load %arg1[%c0, %c0_0] : memref<8x256xf32, #tpu.memory_space<vmem>>, vector<8x256xf32>
    %1 = arith.truncf %0 : vector<8x256xf32> to vector<8x256xbf16>
    %c0_1 = arith.constant 0 : index
    %c0_2 = arith.constant 0 : index
    %2 = vector.load %arg2[%c0_1, %c0_2] : memref<256x128xbf16, #tpu.memory_space<vmem>>, vector<256x128xbf16>
    %cst = arith.constant dense<0.000000e+00> : vector<8x128xf32>
    %3 = tpu.matmul %1, %2, %cst {dimension_numbers = #tpu.dot_dimension_numbers<[1], [0], [0], [1], [0, 0, 1, 1], [], []>} : vector<8x256xbf16>, vector<256x128xbf16>, vector<8x128xf32> -> vector<8x128xf32>
    %c0_3 = arith.constant 0 : index
    %c0_4 = arith.constant 0 : index
    %4 = vector.load %arg10[%c0_3, %c0_4] : memref<1x128xf32, #tpu.memory_space<vmem>>, vector<1x128xf32>
    %5 = vector.broadcast %4 : vector<1x128xf32> to vector<8x128xf32>
    %6 = arith.addf %3, %5 : vector<8x128xf32>
    %7 = math.tanh %6 : vector<8x128xf32>
    %8 = arith.truncf %7 : vector<8x128xf32> to vector<8x128xbf16>
    %c0_5 = arith.constant 0 : index
    %c0_6 = arith.constant 0 : index
    %9 = vector.load %arg3[%c0_5, %c0_6] : memref<128x64xbf16, #tpu.memory_space<vmem>>, vector<128x64xbf16>
    %cst_7 = arith.constant dense<0.000000e+00> : vector<8x64xf32>
    %10 = tpu.matmul %8, %9, %cst_7 {dimension_numbers = #tpu.dot_dimension_numbers<[1], [0], [0], [1], [0, 0, 1, 1], [], []>} : vector<8x128xbf16>, vector<128x64xbf16>, vector<8x64xf32> -> vector<8x64xf32>
    %c0_8 = arith.constant 0 : index
    %c0_9 = arith.constant 0 : index
    %11 = vector.load %arg11[%c0_8, %c0_9] : memref<1x64xf32, #tpu.memory_space<vmem>>, vector<1x64xf32>
    %12 = vector.broadcast %11 : vector<1x64xf32> to vector<8x64xf32>
    %13 = arith.addf %10, %12 : vector<8x64xf32>
    %14 = math.tanh %13 : vector<8x64xf32>
    %15 = arith.truncf %14 : vector<8x64xf32> to vector<8x64xbf16>
    %c0_10 = arith.constant 0 : index
    %c0_11 = arith.constant 0 : index
    %16 = vector.load %arg4[%c0_10, %c0_11] : memref<64x64xbf16, #tpu.memory_space<vmem>>, vector<64x64xbf16>
    %cst_12 = arith.constant dense<0.000000e+00> : vector<8x64xf32>
    %17 = tpu.matmul %15, %16, %cst_12 {dimension_numbers = #tpu.dot_dimension_numbers<[1], [0], [0], [1], [0, 0, 1, 1], [], []>} : vector<8x64xbf16>, vector<64x64xbf16>, vector<8x64xf32> -> vector<8x64xf32>
    %c0_13 = arith.constant 0 : index
    %c0_14 = arith.constant 0 : index
    %18 = vector.load %arg12[%c0_13, %c0_14] : memref<1x64xf32, #tpu.memory_space<vmem>>, vector<1x64xf32>
    %19 = vector.broadcast %18 : vector<1x64xf32> to vector<8x64xf32>
    %20 = arith.addf %17, %19 : vector<8x64xf32>
    %21 = math.tanh %20 : vector<8x64xf32>
    %22 = arith.truncf %21 : vector<8x64xf32> to vector<8x64xbf16>
    %c0_15 = arith.constant 0 : index
    %c0_16 = arith.constant 0 : index
    %23 = vector.load %arg5[%c0_15, %c0_16] : memref<64x64xbf16, #tpu.memory_space<vmem>>, vector<64x64xbf16>
    %cst_17 = arith.constant dense<0.000000e+00> : vector<8x64xf32>
    %24 = tpu.matmul %22, %23, %cst_17 {dimension_numbers = #tpu.dot_dimension_numbers<[1], [0], [0], [1], [0, 0, 1, 1], [], []>} : vector<8x64xbf16>, vector<64x64xbf16>, vector<8x64xf32> -> vector<8x64xf32>
    %c0_18 = arith.constant 0 : index
    %c0_19 = arith.constant 0 : index
    %25 = vector.load %arg13[%c0_18, %c0_19] : memref<1x64xf32, #tpu.memory_space<vmem>>, vector<1x64xf32>
    %26 = vector.broadcast %25 : vector<1x64xf32> to vector<8x64xf32>
    %27 = arith.addf %24, %26 : vector<8x64xf32>
    %28 = arith.truncf %27 : vector<8x64xf32> to vector<8x64xbf16>
    %c0_20 = arith.constant 0 : index
    %c0_21 = arith.constant 0 : index
    %29 = vector.load %arg6[%c0_20, %c0_21] : memref<64x64xbf16, #tpu.memory_space<vmem>>, vector<64x64xbf16>
    %cst_22 = arith.constant dense<0.000000e+00> : vector<8x64xf32>
    %30 = tpu.matmul %28, %29, %cst_22 {dimension_numbers = #tpu.dot_dimension_numbers<[1], [0], [0], [1], [0, 0, 1, 1], [], []>} : vector<8x64xbf16>, vector<64x64xbf16>, vector<8x64xf32> -> vector<8x64xf32>
    %c0_23 = arith.constant 0 : index
    %c0_24 = arith.constant 0 : index
    %31 = vector.load %arg14[%c0_23, %c0_24] : memref<1x64xf32, #tpu.memory_space<vmem>>, vector<1x64xf32>
    %32 = vector.broadcast %31 : vector<1x64xf32> to vector<8x64xf32>
    %33 = arith.addf %30, %32 : vector<8x64xf32>
    %34 = math.tanh %33 : vector<8x64xf32>
    %35 = arith.truncf %34 : vector<8x64xf32> to vector<8x64xbf16>
    %c0_25 = arith.constant 0 : index
    %c0_26 = arith.constant 0 : index
    %36 = vector.load %arg7[%c0_25, %c0_26] : memref<64x64xbf16, #tpu.memory_space<vmem>>, vector<64x64xbf16>
    %cst_27 = arith.constant dense<0.000000e+00> : vector<8x64xf32>
    %37 = tpu.matmul %35, %36, %cst_27 {dimension_numbers = #tpu.dot_dimension_numbers<[1], [0], [0], [1], [0, 0, 1, 1], [], []>} : vector<8x64xbf16>, vector<64x64xbf16>, vector<8x64xf32> -> vector<8x64xf32>
    %c0_28 = arith.constant 0 : index
    %c0_29 = arith.constant 0 : index
    %38 = vector.load %arg15[%c0_28, %c0_29] : memref<1x64xf32, #tpu.memory_space<vmem>>, vector<1x64xf32>
    %39 = vector.broadcast %38 : vector<1x64xf32> to vector<8x64xf32>
    %40 = arith.addf %37, %39 : vector<8x64xf32>
    %41 = math.tanh %40 : vector<8x64xf32>
    %42 = arith.truncf %41 : vector<8x64xf32> to vector<8x64xbf16>
    %c0_30 = arith.constant 0 : index
    %c0_31 = arith.constant 0 : index
    %43 = vector.load %arg8[%c0_30, %c0_31] : memref<64x128xbf16, #tpu.memory_space<vmem>>, vector<64x128xbf16>
    %cst_32 = arith.constant dense<0.000000e+00> : vector<8x128xf32>
    %44 = tpu.matmul %42, %43, %cst_32 {dimension_numbers = #tpu.dot_dimension_numbers<[1], [0], [0], [1], [0, 0, 1, 1], [], []>} : vector<8x64xbf16>, vector<64x128xbf16>, vector<8x128xf32> -> vector<8x128xf32>
    %c0_33 = arith.constant 0 : index
    %c0_34 = arith.constant 0 : index
    %45 = vector.load %arg16[%c0_33, %c0_34] : memref<1x128xf32, #tpu.memory_space<vmem>>, vector<1x128xf32>
    %46 = vector.broadcast %45 : vector<1x128xf32> to vector<8x128xf32>
    %47 = arith.addf %44, %46 : vector<8x128xf32>
    %48 = math.tanh %47 : vector<8x128xf32>
    %49 = arith.truncf %48 : vector<8x128xf32> to vector<8x128xbf16>
    %c0_35 = arith.constant 0 : index
    %c0_36 = arith.constant 0 : index
    %50 = vector.load %arg9[%c0_35, %c0_36] : memref<128x256xbf16, #tpu.memory_space<vmem>>, vector<128x256xbf16>
    %cst_37 = arith.constant dense<0.000000e+00> : vector<8x256xf32>
    %51 = tpu.matmul %49, %50, %cst_37 {dimension_numbers = #tpu.dot_dimension_numbers<[1], [0], [0], [1], [0, 0, 1, 1], [], []>} : vector<8x128xbf16>, vector<128x256xbf16>, vector<8x256xf32> -> vector<8x256xf32>
    %c0_38 = arith.constant 0 : index
    %c0_39 = arith.constant 0 : index
    %52 = vector.load %arg17[%c0_38, %c0_39] : memref<1x256xf32, #tpu.memory_space<vmem>>, vector<1x256xf32>
    %53 = vector.broadcast %52 : vector<1x256xf32> to vector<8x256xf32>
    %54 = arith.addf %51, %53 : vector<8x256xf32>
    %c0_40 = arith.constant 0 : index
    %c0_41 = arith.constant 0 : index
    %55 = vector.load %arg18[%c0_40, %c0_41] : memref<8x256xf32, #tpu.memory_space<vmem>>, vector<8x256xf32>
    tpu.vector_store %arg18[%c0_40, %c0_41], %54 {strides = array<i32>} : memref<8x256xf32, #tpu.memory_space<vmem>>, vector<8x256xf32>,
    return
  }
  func.func @transform_0(%arg0: i32) -> (i32, i32) {
    %c0_i32 = arith.constant 0 : i32
    %c0_i32_0 = arith.constant 0 : i32
    return %arg0, %c0_i32 : i32, i32
  }
  func.func @transform_1(%arg0: i32) -> (i32, i32) {
    %c0_i32 = arith.constant 0 : i32
    %c0_i32_0 = arith.constant 0 : i32
    %c0_i32_1 = arith.constant 0 : i32
    return %c0_i32, %c0_i32_0 : i32, i32
  }
  func.func @transform_2(%arg0: i32) -> (i32, i32) {
    %c0_i32 = arith.constant 0 : i32
    %c0_i32_0 = arith.constant 0 : i32
    %c0_i32_1 = arith.constant 0 : i32
    return %c0_i32, %c0_i32_0 : i32, i32
  }
  func.func @transform_3(%arg0: i32) -> (i32, i32) {
    %c0_i32 = arith.constant 0 : i32
    %c0_i32_0 = arith.constant 0 : i32
    %c0_i32_1 = arith.constant 0 : i32
    return %c0_i32, %c0_i32_0 : i32, i32
  }
  func.func @transform_4(%arg0: i32) -> (i32, i32) {
    %c0_i32 = arith.constant 0 : i32
    %c0_i32_0 = arith.constant 0 : i32
    %c0_i32_1 = arith.constant 0 : i32
    return %c0_i32, %c0_i32_0 : i32, i32
  }
  func.func @transform_5(%arg0: i32) -> (i32, i32) {
    %c0_i32 = arith.constant 0 : i32
    %c0_i32_0 = arith.constant 0 : i32
    %c0_i32_1 = arith.constant 0 : i32
    return %c0_i32, %c0_i32_0 : i32, i32
  }
  func.func @transform_6(%arg0: i32) -> (i32, i32) {
    %c0_i32 = arith.constant 0 : i32
    %c0_i32_0 = arith.constant 0 : i32
    %c0_i32_1 = arith.constant 0 : i32
    return %c0_i32, %c0_i32_0 : i32, i32
  }
  func.func @transform_7(%arg0: i32) -> (i32, i32) {
    %c0_i32 = arith.constant 0 : i32
    %c0_i32_0 = arith.constant 0 : i32
    %c0_i32_1 = arith.constant 0 : i32
    return %c0_i32, %c0_i32_0 : i32, i32
  }
  func.func @transform_8(%arg0: i32) -> (i32, i32) {
    %c0_i32 = arith.constant 0 : i32
    %c0_i32_0 = arith.constant 0 : i32
    %c0_i32_1 = arith.constant 0 : i32
    return %c0_i32, %c0_i32_0 : i32, i32
  }
  func.func @transform_9(%arg0: i32) -> (i32, i32) {
    %c0_i32 = arith.constant 0 : i32
    %c0_i32_0 = arith.constant 0 : i32
    %c0_i32_1 = arith.constant 0 : i32
    return %c0_i32, %c0_i32_0 : i32, i32
  }
  func.func @transform_10(%arg0: i32) -> (i32, i32) {
    %c0_i32 = arith.constant 0 : i32
    %c0_i32_0 = arith.constant 0 : i32
    %c0_i32_1 = arith.constant 0 : i32
    return %c0_i32, %c0_i32_0 : i32, i32
  }
  func.func @transform_11(%arg0: i32) -> (i32, i32) {
    %c0_i32 = arith.constant 0 : i32
    %c0_i32_0 = arith.constant 0 : i32
    %c0_i32_1 = arith.constant 0 : i32
    return %c0_i32, %c0_i32_0 : i32, i32
  }
  func.func @transform_12(%arg0: i32) -> (i32, i32) {
    %c0_i32 = arith.constant 0 : i32
    %c0_i32_0 = arith.constant 0 : i32
    %c0_i32_1 = arith.constant 0 : i32
    return %c0_i32, %c0_i32_0 : i32, i32
  }
  func.func @transform_13(%arg0: i32) -> (i32, i32) {
    %c0_i32 = arith.constant 0 : i32
    %c0_i32_0 = arith.constant 0 : i32
    %c0_i32_1 = arith.constant 0 : i32
    return %c0_i32, %c0_i32_0 : i32, i32
  }
  func.func @transform_14(%arg0: i32) -> (i32, i32) {
    %c0_i32 = arith.constant 0 : i32
    %c0_i32_0 = arith.constant 0 : i32
    %c0_i32_1 = arith.constant 0 : i32
    return %c0_i32, %c0_i32_0 : i32, i32
  }
  func.func @transform_15(%arg0: i32) -> (i32, i32) {
    %c0_i32 = arith.constant 0 : i32
    %c0_i32_0 = arith.constant 0 : i32
    %c0_i32_1 = arith.constant 0 : i32
    return %c0_i32, %c0_i32_0 : i32, i32
  }
  func.func @transform_16(%arg0: i32) -> (i32, i32) {
    %c0_i32 = arith.constant 0 : i32
    %c0_i32_0 = arith.constant 0 : i32
    %c0_i32_1 = arith.constant 0 : i32
    return %c0_i32, %c0_i32_0 : i32, i32
  }
  func.func @transform_17(%arg0: i32) -> (i32, i32) {
    %c0_i32 = arith.constant 0 : i32
    %c0_i32_0 = arith.constant 0 : i32
    return %arg0, %c0_i32 : i32, i32
  }
}

</mosaic_0001>

<bundles_post_ra>
// kernel: mlp_module_64_short.1
= control target key start
LH: loop header
LB: loop body
LE: loop exit
PB: predicated region body
PF: predicated region fallthrough
CT: control target
= control target key end

     0   :  { %s1760_s0 = inlined_call_operand.hbm [shape: f32[8,256], index: 0, kind: input, shape index: {}]   ;;  %s1761_s1 = inlined_call_operand.hbm [shape: bf16[256,128], index: 1, kind: input, shape index: {}]   ;;  %s1762_s2 = inlined_call_operand.vmem [shape: bf16[128,64], index: 2, kind: input, shape index: {}]   ;;  %s1763_s3 = inlined_call_operand.vmem [shape: bf16[64,64], index: 3, kind: input, shape index: {}]   ;;  %s1764_s4 = inlined_call_operand.vmem [shape: bf16[64,64], index: 4, kind: input, shape index: {}]   ;;  %s1765_s5 = inlined_call_operand.vmem [shape: bf16[64,64], index: 5, kind: input, shape index: {}]   ;;  %s1766_s6 = inlined_call_operand.hbm [shape: bf16[64,64], index: 6, kind: input, shape index: {}]   ;;  %s1767_s7 = inlined_call_operand.hbm [shape: bf16[64,128], index: 7, kind: input, shape index: {}]   ;;  %s1768_s8 = inlined_call_operand.hbm [shape: bf16[128,256], index: 8, kind: input, shape index: {}]   ;;  %s1769_s9 = inlined_call_operand.vmem [shape: f32[1,128], index: 9, kind: input, shape index: {}]   ;;  %s1770_s10 = inlined_call_operand.vmem [shape: f32[1,64], index: 10, kind: input, shape index: {}]   ;;  %s1771_s11 = inlined_call_operand.vmem [shape: f32[1,64], index: 11, kind: input, shape index: {}]   ;;  %s1772_s12 = inlined_call_operand.vmem [shape: f32[1,64], index: 12, kind: input, shape index: {}]   ;;  %s1773_s13 = inlined_call_operand.vmem [shape: f32[1,64], index: 13, kind: input, shape index: {}]   ;;  %s1774_s14 = inlined_call_operand.vmem [shape: f32[1,64], index: 14, kind: input, shape index: {}]   ;;  %s1775_s15 = inlined_call_operand.vmem [shape: f32[1,128], index: 15, kind: input, shape index: {}]   ;;  %s1776_s16 = inlined_call_operand.vmem [shape: f32[1,256], index: 16, kind: input, shape index: {}]   ;;  %s1777_s17 = inlined_call_operand.hbm [shape: f32[8,256], index: 17, kind: output, shape index: {}]  }
   0x1   :  { %1781 = sst [smem:[#allocation16_spill]] %s1760_s0 }
   0x2   :  { %1782 = sst [smem:[#allocation17_spill]] %s1761_s1 }
   0x3   :  { %1783 = sst [smem:[#allocation18_spill]] %s1776_s16 }
   0x4   :  { %1784 = sst [smem:[#allocation19_spill]] %s1777_s17 }
   0x5   :  { %22 = vsyncpa [#allocation3], 0 }
   0x6   :  { %23 = vsyncpa [#allocation6], 0 }
   0x7   :  { %24 = vsyncpa [#allocation9], 0 }
   0x8   :  { %25 = vsyncpa [#allocation4], 0  ;;  %s1447_s24 = smov [#allocation5]   ;;  %s1785_s28 = sld [smem:[#allocation17_spill]] }
   0x9   :  { %s41_s25 = sshll.u32 %s1447_s24, 4  ;;  %s42_s25 = int_to_ptr.vmem [resolvable:$true] %s41_s25 }
   0xe   :  { %s1307_s29 = scalar_lea.hbm %s1785_s28, 2048 }
   0xf   :  { %p1308_p0 = scmp.ne.s32.totalorder %s1785_s28, %s1307_s29  ;;  %p1311_p1 = scmp.lt.u32.totalorder %s1307_s29, %s1785_s28 }
  0x11   :  { %p1313_p2 = pnand %p1311_p1, %p1308_p0 }
  0x13   :  { %1316 = shalt.err (!%p1313_p2)
}
  0x14   :  { %s1317_s1 = scalar_lea.vmem %s42_s25, 2048  ;;  %p1322_p4 = scmp.lt.s32.totalorder %s42_s25, %s42_s25 }
  0x15   :  { %p1318_p3 = scmp.ne.s32.totalorder %s42_s25, %s1317_s1  ;;  %p1323_p5 = scmp.lt.s32.totalorder %s1317_s1, %s1317_s1 }
  0x17   :  { %p1324_p6 = por %p1323_p5, %p1322_p4 }
  0x19   :  { %p1325_p7 = pnand %p1324_p6, %p1318_p3 }
  0x1b   :  { %1328 = shalt.err (!%p1325_p7)
}
  0x1c   :  { %s1448_s20 = smov 64   ;;  %s1449_s21 = smov 4  }
  0x1d   :  { %47 = dma.hbm_to_vmem [thread:$0]  %s1785_s28, 2048, %s42_s25, [#allocation6], %s1448_s20, %s1448_s20, %s1449_s21  }
  0x1e   :  { %s1450_s24 = smov [#allocation8]   ;;  %s1451_s27 = smov [#allocation2]  }
  0x1f   :  { %s73_s26 = sshll.u32 %s1450_s24, 4  ;;  %s32_s29 = sshll.u32 %s1451_s27, 4  ;;  %s74_s26 = int_to_ptr.vmem [resolvable:$true] %s73_s26  ;;  %s33_s29 = int_to_ptr.vmem [resolvable:$true] %s32_s29 }
  0x20   :  { %s1329_s18 = scalar_lea.hbm %s1767_s7, 512 }
  0x21   :  { %p1330_p8 = scmp.ne.s32.totalorder %s1767_s7, %s1329_s18  ;;  %p1333_p9 = scmp.lt.u32.totalorder %s1329_s18, %s1767_s7 }
  0x23   :  { %p1335_p10 = pnand %p1333_p9, %p1330_p8 }
  0x25   :  { %1338 = shalt.err (!%p1335_p10)
}
  0x26   :  { %s1339_s25 = scalar_lea.vmem %s74_s26, 512  ;;  %p1344_p12 = scmp.lt.s32.totalorder %s74_s26, %s74_s26 }
  0x27   :  { %p1340_p11 = scmp.ne.s32.totalorder %s74_s26, %s1339_s25  ;;  %p1345_p13 = scmp.lt.s32.totalorder %s1339_s25, %s1339_s25 }
  0x29   :  { %p1346_p0 = por %p1345_p13, %p1344_p12 }
  0x2b   :  { %p1347_p1 = pnand %p1346_p0, %p1340_p11 }
  0x2d   :  { %1350 = shalt.err (!%p1347_p1)
}
  0x2e   :  { %79 = dma.hbm_to_vmem [thread:$0]  %s1767_s7, 512, %s74_s26, [#allocation9], %s1448_s20, %s1448_s20, %s1449_s21  }
  0x2f   :  { %s1786_s17 = sld [smem:[#allocation16_spill]] }
  0x35   :  { %s1351_s24 = scalar_lea.hbm %s1786_s17, 256 }
  0x36   :  { %p1352_p2 = scmp.ne.s32.totalorder %s1786_s17, %s1351_s24  ;;  %p1355_p3 = scmp.lt.u32.totalorder %s1351_s24, %s1786_s17 }
  0x38   :  { %p1357_p4 = pnand %p1355_p3, %p1352_p2 }
  0x3a   :  { %1360 = shalt.err (!%p1357_p4)
}
  0x3b   :  { %s1361_s19 = scalar_lea.vmem %s33_s29, 256  ;;  %p1366_p6 = scmp.lt.s32.totalorder %s33_s29, %s33_s29 }
  0x3c   :  { %p1362_p5 = scmp.ne.s32.totalorder %s33_s29, %s1361_s19  ;;  %p1367_p7 = scmp.lt.s32.totalorder %s1361_s19, %s1361_s19 }
  0x3e   :  { %p1368_p8 = por %p1367_p7, %p1366_p6 }
  0x40   :  { %p1369_p9 = pnand %p1368_p8, %p1362_p5 }
  0x42   :  { %1372 = shalt.err (!%p1369_p9)
}
  0x43   :  { %35 = dma.hbm_to_vmem [thread:$0]  %s1786_s17, 256, %s33_s29, [#allocation3]  }
  0x44   :  { %s1452_s1 = smov [#allocation7]   ;;  %s1453_s28 = smov [#allocation10]  }
  0x45   :  { %s61_s25 = sshll.u32 %s1452_s1, 4  ;;  %s85_s22 = sshll.u32 %s1453_s28, 4  ;;  %s62_s25 = int_to_ptr.vmem [resolvable:$true] %s61_s25  ;;  %s86_s22 = int_to_ptr.vmem [resolvable:$true] %s85_s22 }
  0x46   :  { %s1373_s24 = scalar_lea.hbm %s1766_s6, 512 }
  0x47   :  { %p1374_p10 = scmp.ne.s32.totalorder %s1766_s6, %s1373_s24  ;;  %p1377_p11 = scmp.lt.u32.totalorder %s1373_s24, %s1766_s6 }
  0x49   :  { %p1379_p12 = pnand %p1377_p11, %p1374_p10 }
  0x4b   :  { %1382 = shalt.err (!%p1379_p12)
}
  0x4c   :  { %s1383_s29 = scalar_lea.vmem %s62_s25, 512  ;;  %p1388_p0 = scmp.lt.s32.totalorder %s62_s25, %s62_s25 }
  0x4d   :  { %p1384_p13 = scmp.ne.s32.totalorder %s62_s25, %s1383_s29  ;;  %p1389_p1 = scmp.lt.s32.totalorder %s1383_s29, %s1383_s29 }
  0x4f   :  { %p1390_p2 = por %p1389_p1, %p1388_p0 }
  0x51   :  { %p1391_p3 = pnand %p1390_p2, %p1384_p13 }
  0x53   :  { %1394 = shalt.err (!%p1391_p3)
}
  0x54   :  { %67 = dma.hbm_to_vmem [thread:$0]  %s1766_s6, 512, %s62_s25, [#allocation6], %s1448_s20, %s1448_s20, %s1449_s21  }
  0x55   :  { %s1395_s1 = scalar_lea.hbm %s1768_s8, 2048 }
  0x56   :  { %p1396_p4 = scmp.ne.s32.totalorder %s1768_s8, %s1395_s1  ;;  %p1399_p5 = scmp.lt.u32.totalorder %s1395_s1, %s1768_s8 }
  0x58   :  { %p1401_p6 = pnand %p1399_p5, %p1396_p4 }
  0x5a   :  { %1404 = shalt.err (!%p1401_p6)
}
  0x5b   :  { %s1405_s27 = scalar_lea.vmem %s86_s22, 2048  ;;  %p1410_p8 = scmp.lt.s32.totalorder %s86_s22, %s86_s22 }
  0x5c   :  { %p1406_p7 = scmp.ne.s32.totalorder %s86_s22, %s1405_s27  ;;  %p1411_p9 = scmp.lt.s32.totalorder %s1405_s27, %s1405_s27 }
  0x5e   :  { %p1412_p10 = por %p1411_p9, %p1410_p8 }
  0x60   :  { %p1413_p11 = pnand %p1412_p10, %p1406_p7 }
  0x62   :  { %1416 = shalt.err (!%p1413_p11)
}
  0x63   :  { %s1454_s6 = smov 128   ;;  %s1455_s20 = smov 8  }
  0x64   :  { %91 = dma.hbm_to_vmem [thread:$0]  %s1768_s8, 2048, %s86_s22, [#allocation9], %s1454_s6, %s1454_s6, %s1455_s20  }
  0x65   :  { %1439 = dma.done.wait [#allocation3], 256  }
  0x66   :  { %1440 = vsyncadd [#allocation3], 4294967040 }
  0x67   :  { %1441 = dma.done.wait [#allocation6], 2560  }
  0x68   :  { %1442 = vsyncadd [#allocation6], 4294964736 }
  0x69   :  { %1443 = dma.done.wait [#allocation9], 2560  }
  0x6a   :  { %1444 = vsyncadd [#allocation9], 4294964736  ;;  %v1456_v0 = vmov 0.0   ;;  %v1227_v1 = vld [vmem:[#allocation5 + $0x40] sm:$0xff]   ;;  %v1229_v3 = vld [vmem:[#allocation5 + $0x48] sm:$0xff]   ;;  %vm1457_vm0 = vmmov 0  }
  0x6b   :  { %1134 = vmatprep.subr.bf16.mxu1 %v1456_v0  ;;  %v1228_v2 = vld [vmem:[#allocation5] sm:$0xff]   ;;  %1078 = vmatprep.subr.bf16.mxu0 %v1227_v1  ;;  %v1230_v4 = vld [vmem:[#allocation5 + $0x8] sm:$0xff]   ;;  %v1231_v5 = vld [vmem:[#allocation5 + $0x50] sm:$0xff]   ;;  %vm457_vm1 = vcmask 523264   ;;  %s1787_s18 = sld [smem:[#allocation18_spill]] }
  0x6c   :  { %1079 = vmatpush3.bf16.msra.mxu0 %v1228_v2  ;;  %v1232_v6 = vld [vmem:[#allocation5 + $0x10] sm:$0xff]   ;;  %v1233_v7 = vld [vmem:[#allocation5 + $0x58] sm:$0xff]   ;;  %v1235_v9 = vld [vmem:[#allocation5 + $0x60] sm:$0xff]   ;;  %1150 = vmatprep.mubr.msk.bf16.mxu1 %vm1457_vm0, %v1456_v0 }
  0x6d   :  { %1080 = vmatprep.subr.bf16.mxu0 %v1229_v3  ;;  %v1234_v8 = vld [vmem:[#allocation5 + $0x18] sm:$0xff]   ;;  %v1236_v10 = vld [vmem:[#allocation5 + $0x20] sm:$0xff]   ;;  %v1237_v11 = vld [vmem:[#allocation5 + $0x68] sm:$0xff]  }
  0x6e   :  { %v125_v12 = vld [vmem:[#allocation2 + $0x8] sm:$0xff]  ;;  %v1238_v13 = vld [vmem:[#allocation5 + $0x28] sm:$0xff]   ;;  %v1243_v15 = vld [vmem:[%s1762_s2] sm:$0xff]  }
  0x6f   :  { %v127_v14 = vpack.c.bf16 %v125_v12, %v125_v12  ;;  %v1239_v16 = vld [vmem:[#allocation5 + $0x70] sm:$0xff]   ;;  %v1244_v17 = vld [vmem:[%s1762_s2 + $0x8] sm:$0xff]   ;;  %1135 = vmatpush3.bf16.msra.mxu1 %v1243_v15  ;;  %v1245_v20 = vld [vmem:[%s1762_s2 + $0x10] sm:$0xff]  }
  0x70   :  { %1081 = vmatpush3.bf16.msra.mxu0 %v1230_v4  ;;  %v1240_v18 = vld [vmem:[#allocation5 + $0x30] sm:$0xff]   ;;  %1136 = vmatprep.subr.bf16.mxu1 %v1456_v0  ;;  %v1241_v19 = vld [vmem:[#allocation5 + $0x78] sm:$0xff]   ;;  %v1246_v24 = vld [vmem:[%s1762_s2 + $0x18] sm:$0xff]  }
  0x71   :  { %1082 = vmatprep.subr.bf16.mxu0 %v1231_v5  ;;  %295 = vmatprep.mubr.bf16.mxu0 %v127_v14  ;;  %v1242_v21 = vld [vmem:[#allocation5 + $0x38] sm:$0xff]   ;;  %v124_v22 = vld [vmem:[#allocation2] sm:$0xff]  ;;  %v1249_v27 = vld [vmem:[%s1762_s2 + $0x30] sm:$0xff]  }
  0x72   :  { %v126_v23 = vpack.c.bf16 %v124_v22, %v124_v22  ;;  %v1247_v25 = vld [vmem:[%s1762_s2 + $0x20] sm:$0xff]   ;;  %v1248_v26 = vld [vmem:[%s1762_s2 + $0x28] sm:$0xff]   ;;  %v1250_v28 = vld [vmem:[%s1762_s2 + $0x38] sm:$0xff]  }
  0x73   :  { %1137 = vmatpush3.bf16.msra.mxu1 %v1244_v17  ;;  %v1006_v30 = vld [vmem:[%s1769_s9] ss:$0 sm:$0xff]  ;;  %v1252_v39 = vld [vmem:[%s1763_s3 + $0x8] sm:$0xff]   ;;  %v1253_v40 = vld [vmem:[%s1763_s3 + $0x10] sm:$0xff]  }
  0x74   :  { %1083 = vmatpush3.bf16.msra.mxu0 %v1232_v6  ;;  %1138 = vmatprep.subr.bf16.mxu1 %v1456_v0  ;;  %v1251_v38 = vld [vmem:[%s1763_s3] sm:$0xff]   ;;  %v1254_v41 = vld [vmem:[%s1763_s3 + $0x18] sm:$0xff]   ;;  %v1256_v51 = vld [vmem:[%s1764_s4 + $0x8] sm:$0xff]  }
  0x75   :  { %1084 = vmatprep.subr.bf16.mxu0 %v1233_v7  ;;  %v1023_v42 = vld [vmem:[%s1770_s10] ss:$0 sm:$0xff]  ;;  %v1257_v52 = vld [vmem:[%s1764_s4 + $0x10] sm:$0xff]   ;;  %v1258_v53 = vld [vmem:[%s1764_s4 + $0x18] sm:$0xff]  }
  0x76   :  { %v1255_v50 = vld [vmem:[%s1764_s4] sm:$0xff]   ;;  %v1260_v55 = vld [vmem:[%s1765_s5 + $0x8] sm:$0xff]   ;;  %v1261_v56 = vld [vmem:[%s1765_s5 + $0x10] sm:$0xff]  }
  0x77   :  { %1139 = vmatpush3.bf16.msra.mxu1 %v1245_v20  ;;  %v1259_v54 = vld [vmem:[%s1765_s5] sm:$0xff]   ;;  %v1262_v2 = vld [vmem:[%s1765_s5 + $0x18] sm:$0xff]   ;;  %v1267_v22 = vld [vmem:[#allocation8] sm:$0xff]  }
  0x78   :  { %1085 = vmatpush3.bf16.msra.mxu0 %v1234_v8  ;;  %1140 = vmatprep.subr.bf16.mxu1 %v1456_v0  ;;  %v1032_v57 = vld [vmem:[%s1771_s11] ss:$0 sm:$0xff] }
  0x79   :  { %1086 = vmatprep.subr.bf16.mxu0 %v1235_v9  ;;  %v1038_v3 = vld [vmem:[%s1772_s12] ss:$0 sm:$0xff] }
  0x7a   :  { %v1265_v12 = vld [vmem:[#allocation7 + $0x10] sm:$0xff]  }
  0x7b   :  { %1141 = vmatpush3.bf16.msra.mxu1 %v1246_v24  ;;  %v1044_v14 = vld [vmem:[%s1773_s13] ss:$0 sm:$0xff] }
  0x7c   :  { %1087 = vmatpush3.bf16.msra.mxu0 %v1236_v10  ;;  %1142 = vmatprep.subr.bf16.mxu1 %v1456_v0  ;;  %v1263_v10 = vld [vmem:[#allocation7] sm:$0xff]   ;;  %v1269_v24 = vld [vmem:[#allocation8 + $0x10] sm:$0xff]  }
  0x7d   :  { %1088 = vmatprep.subr.bf16.mxu0 %v1237_v11  ;;  %v1264_v11 = vld [vmem:[#allocation7 + $0x8] sm:$0xff]  }
  0x7f   :  { %1143 = vmatpush3.bf16.msra.mxu1 %v1247_v25  ;;  %v1270_v25 = vld [vmem:[#allocation8 + $0x18] sm:$0xff]  }
  0x80   :  { %1089 = vmatpush3.bf16.msra.mxu0 %v1238_v13  ;;  %1144 = vmatprep.subr.bf16.mxu1 %v1456_v0  ;;  %v1266_v13 = vld [vmem:[#allocation7 + $0x18] sm:$0xff]  }
  0x81   :  { %1090 = vmatprep.subr.bf16.mxu0 %v1239_v16 }
  0x83   :  { %1145 = vmatpush3.bf16.msra.mxu1 %v1248_v26  ;;  %v1271_v26 = vld [vmem:[#allocation10] ss:$8 sps:$4 sm:$0xff]  }
  0x84   :  { %1091 = vmatpush3.bf16.msra.mxu0 %v1240_v18  ;;  %1146 = vmatprep.subr.bf16.mxu1 %v1456_v0 }
  0x85   :  { %1092 = vmatprep.subr.bf16.mxu0 %v1241_v19 }
  0x87   :  { %1147 = vmatpush3.bf16.msra.mxu1 %v1249_v27  ;;  %v1273_v27 = vld [vmem:[#allocation10 + $0x4] ss:$8 sps:$4 sm:$0xff]  }
  0x88   :  { %1093 = vmatpush3.bf16.msra.mxu0 %v1242_v21  ;;  %1148 = vmatprep.subr.bf16.mxu1 %v1456_v0 }
  0x89   :  { %1154 = vmatprep.subr.bf16.mxu0 %v1456_v0 }
  0x8b   :  { %296 = vmatmul.mubr.bf16.vlgmr.msra.gmra.mrb[0].mxu0 %v126_v23  ;;  %1149 = vmatpush3.bf16.msra.mxu1 %v1250_v28  ;;  %v1268_v23 = vld [vmem:[#allocation8 + $0x8] sm:$0xff]   ;;  %v1276_v28 = vld [vmem:[#allocation10 + $0x14] ss:$8 sps:$4 sm:$0xff]  }
  0x8c   :  { %1162 = vmatprep.mubr.msk.bf16.mxu0 %vm1457_vm0, %v1456_v0  ;;  %1166 = vmatprep.subr.bf16.mxu1 %v1456_v0 }
  0x8d   :  { %1155 = vmatpush3.bf16.msra.mxu0 %v1251_v38 }
  0x8e   :  { %1156 = vmatprep.subr.bf16.mxu0 %v1456_v0 }
  0x91   :  { %1157 = vmatpush3.bf16.msra.mxu0 %v1252_v39 }
  0x92   :  { %1158 = vmatprep.subr.bf16.mxu0 %v1456_v0 }
  0x95   :  { %1159 = vmatpush3.bf16.msra.mxu0 %v1253_v40 }
  0x96   :  { %1160 = vmatprep.subr.bf16.mxu0 %v1456_v0 }
  0x99   :  { %1161 = vmatpush3.bf16.msra.mxu0 %v1254_v41  ;;  %v1285_v41 = vld [vmem:[#allocation10 + $0x44] ss:$8 sps:$4 sm:$0xff]  }
  0x9a   :  { %1178 = vmatprep.subr.bf16.mxu0 %v1456_v0 }
 0x15e   :  { %v1094_v29 = vpop.f32.mrb[0].mxu0 }
 0x15f   :  { %v1095_v31 = vpop.f32.mrb[1].mxu0 }
 0x160   :  { %v1096_v32 = vadd.f32 %v1095_v31, %v1094_v29  ;;  %v1097_v33 = vpop.f32.mrb[2].mxu0  ;;  %v1274_v29 = vld [vmem:[#allocation10 + $0x10] ss:$8 sps:$4 sm:$0xff]   ;;  %v1277_v31 = vld [vmem:[#allocation10 + $0x20] ss:$8 sps:$4 sm:$0xff]  }
 0x161   :  { %v1098_v34 = vpop.f32.mrb[3].mxu0  ;;  %v1280_v33 = vld [vmem:[#allocation10 + $0x30] ss:$8 sps:$4 sm:$0xff]  }
 0x162   :  { %v298_v35 = vadd.f32 %v1096_v32, %v1006_v30  ;;  %v1279_v30 = vld [vmem:[#allocation10 + $0x24] ss:$8 sps:$4 sm:$0xff]   ;;  %v1282_v32 = vld [vmem:[#allocation10 + $0x34] ss:$8 sps:$4 sm:$0xff]  }
 0x164   :  { %1295 = vtanh.f32 %v298_v35 }
 0x16e   :  { %v1296_v36 = vpop.eup %1295 }
 0x16f   :  { %v304_v37 = vpack.c.bf16 %v1296_v36, %v1296_v36 }
 0x171   :  { %1151 = vmatmul.mubr.bf16.vlgmr.msra.gmra.mrb[0].mxu1 %v304_v37 }
 0x172   :  { %1174 = vmatprep.mubr.msk.bf16.mxu1 %vm1457_vm0, %v1456_v0  ;;  %1167 = vmatpush3.bf16.msra.mxu1 %v1255_v50  ;;  %v1056_v50 = vld [vmem:[%s1775_s15] ss:$0 sm:$0xff]  ;;  %s1459_s15 = smov [#allocation11]  }
 0x173   :  { %1168 = vmatprep.subr.bf16.mxu1 %v1456_v0  ;;  %s995_s29 = sshll.u32 %s1459_s15, 4  ;;  %s996_s29 = int_to_ptr.vmem [resolvable:$true] %s995_s29 }
 0x174   :  { %s1417_s3 = scalar_lea.vmem %s996_s29, 256  ;;  %p1422_p13 = scmp.lt.s32.totalorder %s996_s29, %s996_s29 }
 0x175   :  { %p1418_p12 = scmp.ne.s32.totalorder %s996_s29, %s1417_s3  ;;  %p1423_p0 = scmp.lt.s32.totalorder %s1417_s3, %s1417_s3 }
 0x176   :  { %1169 = vmatpush3.bf16.msra.mxu1 %v1256_v51 }
 0x177   :  { %1170 = vmatprep.subr.bf16.mxu1 %v1456_v0  ;;  %p1424_p1 = por %p1423_p0, %p1422_p13 }
 0x179   :  { %p1425_p2 = pnand %p1424_p1, %p1418_p12 }
 0x17a   :  { %1171 = vmatpush3.bf16.msra.mxu1 %v1257_v52 }
 0x17b   :  { %1172 = vmatprep.subr.bf16.mxu1 %v1456_v0 }
 0x17e   :  { %1173 = vmatpush3.bf16.msra.mxu1 %v1258_v53 }
 0x17f   :  { %1190 = vmatprep.subr.bf16.mxu1 %v1456_v0 }
 0x244   :  { %v410_v43 = vpop.f32.mrb[0].mxu1 }
 0x245   :  { %v411_v44 = vadd.f32 %v1023_v42, %v410_v43  ;;  %v1152_v45 = vpop.f32.mrb[1].mxu1  ;;  %v1283_v42 = vld [vmem:[#allocation10 + $0x40] ss:$8 sps:$4 sm:$0xff]   ;;  %v1288_v43 = vld [vmem:[#allocation10 + $0x54] ss:$8 sps:$4 sm:$0xff]  }
 0x246   :  { %v413_v46 = vpop.f32.mrb[2].mxu1  ;;  %v1291_v45 = vld [vmem:[#allocation10 + $0x64] ss:$8 sps:$4 sm:$0xff]  }
 0x247   :  { %1297 = vtanh.f32 %v411_v44  ;;  %v1153_v47 = vpop.f32.mrb[3].mxu1  ;;  %v1286_v44 = vld [vmem:[#allocation10 + $0x50] ss:$8 sps:$4 sm:$0xff]   ;;  %v1289_v46 = vld [vmem:[#allocation10 + $0x60] ss:$8 sps:$4 sm:$0xff]  }
 0x248   :  { %v1294_v47 = vld [vmem:[#allocation10 + $0x74] ss:$8 sps:$4 sm:$0xff]  }
 0x251   :  { %v1298_v48 = vpop.eup %1297 }
 0x252   :  { %v417_v49 = vpack.c.bf16 %v1298_v48, %v1298_v48  ;;  %v1292_v48 = vld [vmem:[#allocation10 + $0x70] ss:$8 sps:$4 sm:$0xff]  }
 0x254   :  { %1163 = vmatmul.mubr.msk.bf16.vlgmr.msra.gmra.mrb[4].mxu0 %vm457_vm1, %v417_v49  ;;  %v1458_v49 = vmov 0  }
 0x255   :  { %1186 = vmatprep.mubr.msk.bf16.mxu0 %vm1457_vm0, %v1456_v0  ;;  %1179 = vmatpush3.bf16.msra.mxu0 %v1259_v54 }
 0x256   :  { %1180 = vmatprep.subr.bf16.mxu0 %v1456_v0 }
 0x259   :  { %1181 = vmatpush3.bf16.msra.mxu0 %v1260_v55 }
 0x25a   :  { %1182 = vmatprep.subr.bf16.mxu0 %v1456_v0 }
 0x25d   :  { %1183 = vmatpush3.bf16.msra.mxu0 %v1261_v56 }
 0x25e   :  { %1184 = vmatprep.subr.bf16.mxu0 %v1456_v0 }
 0x261   :  { %1185 = vmatpush3.bf16.msra.mxu0 %v1262_v2 }
 0x262   :  { %1202 = vmatprep.subr.bf16.mxu0 %v1456_v0 }
 0x327   :  { %v495_v58 = vpop.f32.mrb[4].mxu0 }
 0x328   :  { %v496_v59 = vadd.f32 %v1032_v57, %v495_v58  ;;  %v1164_v60 = vpop.f32.mrb[5].mxu0  ;;  %v856_v58 = vlaneseq }
 0x329   :  { %v498_v61 = vpop.f32.mrb[6].mxu0 }
 0x32a   :  { %1299 = vtanh.f32 %v496_v59  ;;  %v1165_v62 = vpop.f32.mrb[7].mxu0  ;;  %v857_v59 = vshrl.u32 %v856_v58, 7  ;;  %v854_v61 = vld [vmem:[%s1787_s18] sm:$0x3] }
 0x32c   :  { %v858_v60 = vsub.s32 0, %v857_v59  ;;  %v862_v62 = vsub.s32 1, %v857_v59 }
 0x334   :  { %v1300_v63 = vpop.eup %1299 }
 0x335   :  { %v502_v1 = vpack.c.bf16 %v1300_v63, %v1300_v63  ;;  %v859_v63 = vrot.slane %v854_v61, %v858_v60 }
 0x337   :  { %1175 = vmatmul.mubr.msk.bf16.vlgmr.msra.gmra.mrb[4].mxu1 %vm457_vm1, %v502_v1  ;;  %v863_v1 = vrot.slane %v854_v61, %v862_v62 }
 0x338   :  { %1198 = vmatprep.mubr.msk.bf16.mxu1 %vm1457_vm0, %v1456_v0  ;;  %1191 = vmatpush3.bf16.msra.mxu1 %v1263_v10 }
 0x339   :  { %1192 = vmatprep.subr.bf16.mxu1 %v1456_v0 }
 0x33c   :  { %1193 = vmatpush3.bf16.msra.mxu1 %v1264_v11 }
 0x33d   :  { %1194 = vmatprep.subr.bf16.mxu1 %v1456_v0 }
 0x340   :  { %1195 = vmatpush3.bf16.msra.mxu1 %v1265_v12 }
 0x341   :  { %1196 = vmatprep.subr.bf16.mxu1 %v1456_v0 }
 0x344   :  { %1197 = vmatpush3.bf16.msra.mxu1 %v1266_v13 }
 0x345   :  { %946 = vmatprep.subr.bf16.mxu1 %v1273_v27 }
 0x40a   :  { %v579_v4 = vpop.f32.mrb[4].mxu1 }
 0x40b   :  { %v580_v5 = vadd.f32 %v1038_v3, %v579_v4  ;;  %v1176_v6 = vpop.f32.mrb[5].mxu1 }
 0x40c   :  { %v582_v7 = vpop.f32.mrb[6].mxu1 }
 0x40d   :  { %v585_v8 = vpack.c.bf16 %v580_v5, %v580_v5  ;;  %v1177_v9 = vpop.f32.mrb[7].mxu1 }
 0x40f   :  { %1187 = vmatmul.mubr.msk.bf16.vlgmr.msra.gmra.mrb[8].mxu0 %vm457_vm1, %v585_v8 }
 0x410   :  { %1210 = vmatprep.mubr.msk.bf16.mxu0 %vm1457_vm0, %v1456_v0  ;;  %1203 = vmatpush3.bf16.msra.mxu0 %v1267_v22 }
 0x411   :  { %1204 = vmatprep.subr.bf16.mxu0 %v1456_v0 }
 0x414   :  { %1205 = vmatpush3.bf16.msra.mxu0 %v1268_v23 }
 0x415   :  { %1206 = vmatprep.subr.bf16.mxu0 %v1456_v0 }
 0x418   :  { %1207 = vmatpush3.bf16.msra.mxu0 %v1269_v24 }
 0x419   :  { %1208 = vmatprep.subr.bf16.mxu0 %v1456_v0  ;;  %v1050_v0 = vld [vmem:[%s1774_s14] ss:$0 sm:$0xff] }
 0x41c   :  { %1209 = vmatpush3.bf16.msra.mxu0 %v1270_v25 }
 0x4e2   :  { %v662_v15 = vpop.f32.mrb[8].mxu0 }
 0x4e3   :  { %v663_v16 = vadd.f32 %v1044_v14, %v662_v15  ;;  %v1188_v17 = vpop.f32.mrb[9].mxu0 }
 0x4e4   :  { %v665_v18 = vpop.f32.mrb[10].mxu0 }
 0x4e5   :  { %1301 = vtanh.f32 %v663_v16  ;;  %v1189_v19 = vpop.f32.mrb[11].mxu0 }
 0x4ef   :  { %v1302_v20 = vpop.eup %1301 }
 0x4f0   :  { %v669_v21 = vpack.c.bf16 %v1302_v20, %v1302_v20 }
 0x4f2   :  { %1199 = vmatmul.mubr.msk.bf16.vlgmr.msra.gmra.mrb[8].mxu1 %vm457_vm1, %v669_v21 }
 0x4f3   :  { %947 = vmatpush1.bf16.msra.mxu1 %v1271_v26  ;;  %978 = vmatprep.mubr.bf16.mxu1 %v1458_v49 }
 0x4f4   :  { %948 = vmatprep.subr.bf16.mxu1 %v1276_v28 }
 0x4f7   :  { %949 = vmatpush1.bf16.msra.mxu1 %v1274_v29 }
 0x4f8   :  { %950 = vmatprep.subr.bf16.mxu1 %v1279_v30 }
 0x4fb   :  { %951 = vmatpush1.bf16.msra.mxu1 %v1277_v31 }
 0x4fc   :  { %952 = vmatprep.subr.bf16.mxu1 %v1282_v32 }
 0x4ff   :  { %953 = vmatpush1.bf16.msra.mxu1 %v1280_v33 }
 0x500   :  { %954 = vmatprep.subr.bf16.mxu1 %v1285_v41 }
 0x503   :  { %955 = vmatpush1.bf16.msra.mxu1 %v1283_v42 }
 0x504   :  { %956 = vmatprep.subr.bf16.mxu1 %v1288_v43 }
 0x507   :  { %957 = vmatpush1.bf16.msra.mxu1 %v1286_v44 }
 0x508   :  { %958 = vmatprep.subr.bf16.mxu1 %v1291_v45 }
 0x50b   :  { %959 = vmatpush1.bf16.msra.mxu1 %v1289_v46 }
 0x50c   :  { %960 = vmatprep.subr.bf16.mxu1 %v1294_v47 }
 0x50f   :  { %961 = vmatpush1.bf16.msra.mxu1 %v1292_v48 }
 0x5c5   :  { %v746_v34 = vpop.f32.mrb[8].mxu1 }
 0x5c6   :  { %v747_v35 = vadd.f32 %v1050_v0, %v746_v34  ;;  %v1200_v36 = vpop.f32.mrb[9].mxu1 }
 0x5c7   :  { %v749_v37 = vpop.f32.mrb[10].mxu1 }
 0x5c8   :  { %1303 = vtanh.f32 %v747_v35  ;;  %v1201_v38 = vpop.f32.mrb[11].mxu1 }
 0x5d2   :  { %v1304_v39 = vpop.eup %1303 }
 0x5d3   :  { %v753_v40 = vpack.c.bf16 %v1304_v39, %v1304_v39 }
 0x5d5   :  { %1211 = vmatmul.mubr.msk.bf16.vlgmr.msra.gmra.mrb[12].mxu0 %vm457_vm1, %v753_v40 }
 0x6a8   :  { %v830_v51 = vpop.f32.mrb[12].mxu0 }
 0x6a9   :  { %v831_v52 = vadd.f32 %v1056_v50, %v830_v51  ;;  %v1212_v53 = vpop.f32.mrb[13].mxu0 }
 0x6aa   :  { %v833_v54 = vpop.f32.mrb[14].mxu0 }
 0x6ab   :  { %1305 = vtanh.f32 %v831_v52  ;;  %v1213_v55 = vpop.f32.mrb[15].mxu0 }
 0x6b5   :  { %v1306_v56 = vpop.eup %1305 }
 0x6b6   :  { %v837_v57 = vpack.c.bf16 %v1306_v56, %v1306_v56 }
 0x6b8   :  { %979 = vmatmul.mubr.bf16.vlgmr.msra.gmra.mrb[12].mxu1 %v837_v57 }
 0x78b   :  { %v980_v2 = vpop.f32.mrb[12].mxu1 }
 0x78c   :  { %v981_v3 = vadd.f32 %v980_v2, %v859_v63  ;;  %v982_v4 = vpop.f32.mrb[13].mxu1 }
 0x78d   :  { %v983_v5 = vadd.f32 %v982_v4, %v863_v1  ;;  %v984_v6 = vpop.f32.mrb[14].mxu1 }
 0x78e   :  { %987 = vst [vmem:[#allocation11] sm:$0xff] %v981_v3  ;;  %v985_v7 = vpop.f32.mrb[15].mxu1 }
 0x78f   :  { %988 = vst [vmem:[#allocation11 + $0x8] sm:$0xff] %v983_v5 }
 0x790   :  { %1428 = shalt.err (!%p1425_p2)
}
 0x791   :  { %s1788_s19 = sld [smem:[#allocation19_spill]] }
 0x797   :  { %s1429_s7 = scalar_lea.hbm %s1788_s19, 256 }
 0x798   :  { %p1430_p3 = scmp.ne.s32.totalorder %s1788_s19, %s1429_s7  ;;  %p1433_p4 = scmp.lt.u32.totalorder %s1429_s7, %s1788_s19 }
 0x79a   :  { %p1435_p5 = pnand %p1433_p4, %p1430_p3 }
 0x79c   :  { %1438 = shalt.err (!%p1435_p5)
}
 0x79d   :  { %998 = dma.vmem_to_hbm [thread:$0]  %s996_s29, 256, %s1788_s19, [#allocation4]  }
 0x79e   :  { %1445 = dma.done.wait [#allocation4], 256  }
 0x79f   :  { %1446 = vsyncadd [#allocation4], 4294967040 }
 0x7a0   :  { %1002 = vsyncpa [#allocation3], 1 }
 0x7a1   :  { %1003 = vsyncpa [#allocation6], 1 }
 0x7a2   :  { %1004 = vsyncpa [#allocation9], 1 }
 0x7a3   :  { %1005 = vsyncpa [#allocation4], 1 }

</bundles_post_ra>
